<compile_context>
chip_gen: v6e
topology: v6e:2x2x1
jax: 0.10.0
libtpu: 0.0.40
codegen_flags: <defaults>
</compile_context>

<pallas_src>
import numpy as np
import jax
import jax.numpy as jnp
from jax import lax
from jax.experimental import pallas as pl
from jax.experimental.pallas import tpu as pltpu

EPSILON = 1e-5
TINY = 1e-30
HIGHEST = lax.Precision.HIGHEST


def gaussian_kernel(sigma, size, norm=True):
    ax = np.arange(size, dtype=np.float64) - (size - 1) / 2.0
    xx, yy = np.meshgrid(ax, ax)
    k = np.exp(-(xx ** 2 + yy ** 2) / (2.0 * sigma ** 2))
    if norm:
        k = k / k.sum()
    return k.astype(np.float32)


def _light_adapt_kernel(x_ref, p_ref, wbd_ref, tn_ref, em_ref, nm_ref, o_ref):
    """Single grid step; all arrays are lane-dense 2-D (rows, HW)."""
    # x rows are (b, c); clamp so log never sees 0 / negatives.
    x = jnp.maximum(x_ref[...], TINY)                       # (B*C, HW)
    logx = jnp.log(x)                                       # EUP, B*C rows

    # num[(b,j,c)] = exp(n[j] * log x[(b,c)]):
    # Tn is a constant (B*NC*C, B*C) matrix with n[j] at the matching (c, b)
    # slot, so one MXU dot performs the per-branch tiling AND the n scaling.
    scaled = jnp.dot(tn_ref[...], logx,
                     preferred_element_type=jnp.float32, precision=HIGHEST)
    num = jnp.exp(scaled)                                   # (B*NC*C, HW) EUP

    # Gaussian local means for all (b, j): one MXU matmul over the im2col
    # patch rows of channel 0 (block-diagonal weights over batch).
    means = jnp.dot(wbd_ref[...], p_ref[...],
                    preferred_element_type=jnp.float32, precision=HIGHEST)
    means = jnp.maximum(means, TINY)                        # (B*NC, HW)
    mean_pow = jnp.exp(nm_ref[...] * jnp.log(means))        # (B*NC, HW) EUP

    # Repeat each branch mean over its C channels: 0/1 expansion matrix on MXU.
    mp_full = jnp.dot(em_ref[...], mean_pow,
                      preferred_element_type=jnp.float32, precision=HIGHEST)

    denom = mp_full + num + EPSILON                         # (B*NC*C, HW) VPU
    r = pl.reciprocal(denom, approx=True)                   # EUP
    r = r * (2.0 - denom * r)                               # Newton step 1 (VPU)
    r = r * (2.0 - denom * r)                               # Newton step 2 (VPU)

    o_ref[...] = num * r - 0.5                              # one unmasked store


def light_adaptation(x, weights, n, kernel_size):
    """x: (B, C, H, W) f32; weights: (NC, K, K) f32 Gaussians; n: (NC,) f32."""
    B, C, H, W = x.shape
    NC = int(n.shape[0])
    K = int(kernel_size)
    pad = (K - 1) // 2
    HW = H * W
    KK = K * K
    f32 = jnp.float32

    # ---------------- wrapper-side layout plumbing (indexing only) ----------
    # Reflect-pad channel 0 and im2col the K*K taps into lane-dense rows.
    x0p = jnp.pad(x[:, 0, :, :], ((0, 0), (pad, pad), (pad, pad)), mode="reflect")
    patches = jnp.stack(
        [x0p[:, ky:ky + H, kx:kx + W].reshape(B, HW)
         for ky in range(K) for kx in range(K)],
        axis=1)                                            # (B, KK, HW)
    patches2d = patches.reshape(B * KK, HW).astype(f32)    # row = b*KK + t

    x2d = x.reshape(B * C, HW).astype(f32)                 # row = b*C + c

    # Tiny constant matrices (built once; all row-gather work goes to the MXU).
    eye_b = jnp.eye(B, dtype=f32)
    w_bd = jnp.kron(eye_b, weights.reshape(NC, KK).astype(f32))     # (B*NC, B*KK)
    tn = jnp.kron(eye_b, jnp.kron(n.astype(f32).reshape(NC, 1),
                                  jnp.eye(C, dtype=f32)))           # (B*NC*C, B*C)
    em = jnp.kron(eye_b, jnp.kron(jnp.eye(NC, dtype=f32),
                                  jnp.ones((C, 1), f32)))           # (B*NC*C, B*NC)
    n_mean = jnp.tile(n.astype(f32), B).reshape(B * NC, 1)          # (B*NC, 1)

    out = pl.pallas_call(
        _light_adapt_kernel,
        out_shape=jax.ShapeDtypeStruct((B * NC * C, HW), f32),
        grid_spec=pltpu.PrefetchScalarGridSpec(
            num_scalar_prefetch=0,
            grid=(1,),                     # toy size: one step, all batches
            in_specs=[
                pl.BlockSpec((B * C, HW), lambda i: (0, 0)),
                pl.BlockSpec((B * KK, HW), lambda i: (0, 0)),
                pl.BlockSpec((B * NC, B * KK), lambda i: (0, 0)),
                pl.BlockSpec((B * NC * C, B * C), lambda i: (0, 0)),
                pl.BlockSpec((B * NC * C, B * NC), lambda i: (0, 0)),
                pl.BlockSpec((B * NC, 1), lambda i: (0, 0)),
            ],
            out_specs=pl.BlockSpec((B * NC * C, HW), lambda i: (0, 0)),
        ),
        compiler_params=pltpu.CompilerParams(
            dimension_semantics=("arbitrary",)),
    )(x2d, patches2d, w_bd, tn, em, n_mean)

    # Row order is (b, j, c) -> contiguous reshape back to (B, NC*C, H, W).
    return out.reshape(B, NC * C, H, W)


def reference(x, weights, n, kernel_size):
    """Pure-JAX reference mirroring the PyTorch forward (full 2-D conv)."""
    B, C, H, W = x.shape
    NC = n.shape[0]
    K = kernel_size
    pad = (K - 1) // 2
    x0 = jnp.pad(x[:, 0], ((0, 0), (pad, pad), (pad, pad)), mode="reflect")[:, None]
    means = [
        lax.conv_general_dilated(x0, weights[j][None, None], (1, 1), "VALID",
                                 precision=HIGHEST)
        for j in range(NC)
    ]
    mean = jnp.concatenate(means, axis=1)                                   # (B, NC, H, W)
    num = x[:, None] ** n[None, :, None, None, None]                        # (B, NC, C, H, W)
    denom = (mean ** n[None, :, None, None])[:, :, None] + num + EPSILON
    return (num / denom).reshape(x.shape[0], -1, H, W) - 0.5


if __name__ == "__main__":
    B, C, H, W = 2, 3, 16, 16       # in_channels=3 image; H*W = 256 (lane-dense)
    NC = 2                          # p_channels and m_channels both present
    K = 5                           # kernel_sizes = [5, 5]
    radii = np.array([2.0, 3.0])
    n_np = np.array([0.5, 0.7], dtype=np.float32)
    w_np = np.stack([gaussian_kernel(radii[i] / np.sqrt(2.0), K, norm=True)
                     for i in range(NC)]).astype(np.float32)

    key = jax.random.PRNGKey(0)
    x = jax.random.uniform(key, (B, C, H, W), jnp.float32, minval=0.05, maxval=1.0)

    weights = jnp.asarray(w_np)
    n = jnp.asarray(n_np)

    out = light_adaptation(x, weights, n, K)
    out = jax.block_until_ready(out)

    ref = reference(x, weights, n, K)
    assert out.shape == (B, NC * C, H, W)
    err = float(np.max(np.abs(np.asarray(out) - np.asarray(ref))))
    assert np.allclose(np.asarray(out), np.asarray(ref), rtol=1e-4, atol=1e-4), err

    print("KERNEL_OK")
</pallas_src>

<mosaic_0001>
module attributes {stable_mosaic.version = 11 : i64} {
  func.func @_light_adapt_kernel(%arg0: i32, %arg1: memref<6x256xf32, #tpu.memory_space<vmem>>, %arg2: memref<50x256xf32, #tpu.memory_space<vmem>>, %arg3: memref<4x50xf32, #tpu.memory_space<vmem>>, %arg4: memref<12x6xf32, #tpu.memory_space<vmem>>, %arg5: memref<12x4xf32, #tpu.memory_space<vmem>>, %arg6: memref<4x1xf32, #tpu.memory_space<vmem>>, %arg7: memref<12x256xf32, #tpu.memory_space<vmem>>) attributes {dimension_semantics = [#tpu.dimension_semantics<arbitrary>], iteration_bounds = array<i64: 1>, scalar_prefetch = 0 : i64, scratch_operands = 0 : i64, tpu.core_type = #tpu.core_type<tc>, window_params = [{pipeline_mode = #tpu.pipeline_mode<synchronous>, transform_indices = @transform_0, window_bounds = array<i64: 6, 256>}, {pipeline_mode = #tpu.pipeline_mode<synchronous>, transform_indices = @transform_1, window_bounds = array<i64: 50, 256>}, {pipeline_mode = #tpu.pipeline_mode<synchronous>, transform_indices = @transform_2, window_bounds = array<i64: 4, 50>}, {pipeline_mode = #tpu.pipeline_mode<synchronous>, transform_indices = @transform_3, window_bounds = array<i64: 12, 6>}, {pipeline_mode = #tpu.pipeline_mode<synchronous>, transform_indices = @transform_4, window_bounds = array<i64: 12, 4>}, {pipeline_mode = #tpu.pipeline_mode<synchronous>, transform_indices = @transform_5, window_bounds = array<i64: 4, 1>}, {pipeline_mode = #tpu.pipeline_mode<synchronous>, transform_indices = @transform_6, window_bounds = array<i64: 12, 256>}]} {
    %c0 = arith.constant 0 : index
    %c0_0 = arith.constant 0 : index
    %0 = vector.load %arg1[%c0, %c0_0] : memref<6x256xf32, #tpu.memory_space<vmem>>, vector<6x256xf32>
    %cst = arith.constant 1.000000e-30 : f32
    %1 = vector.broadcast %cst : f32 to vector<6x256xf32>
    %2 = arith.maximumf %0, %1 : vector<6x256xf32>
    %3 = math.log %2 : vector<6x256xf32>
    %c0_1 = arith.constant 0 : index
    %c0_2 = arith.constant 0 : index
    %4 = vector.load %arg4[%c0_1, %c0_2] : memref<12x6xf32, #tpu.memory_space<vmem>>, vector<12x6xf32>
    %cst_3 = arith.constant dense<0.000000e+00> : vector<12x256xf32>
    %5 = tpu.matmul %4, %3, %cst_3 {dimension_numbers = #tpu.dot_dimension_numbers<[1], [0], [0], [1], [0, 0, 1, 1], [], []>, precision = #tpu.contract_precision<fp32>} : vector<12x6xf32>, vector<6x256xf32>, vector<12x256xf32> -> vector<12x256xf32>
    %6 = math.exp %5 : vector<12x256xf32>
    %c0_4 = arith.constant 0 : index
    %c0_5 = arith.constant 0 : index
    %7 = vector.load %arg3[%c0_4, %c0_5] : memref<4x50xf32, #tpu.memory_space<vmem>>, vector<4x50xf32>
    %c0_6 = arith.constant 0 : index
    %c0_7 = arith.constant 0 : index
    %8 = vector.load %arg2[%c0_6, %c0_7] : memref<50x256xf32, #tpu.memory_space<vmem>>, vector<50x256xf32>
    %cst_8 = arith.constant dense<0.000000e+00> : vector<4x256xf32>
    %9 = tpu.matmul %7, %8, %cst_8 {dimension_numbers = #tpu.dot_dimension_numbers<[1], [0], [0], [1], [0, 0, 1, 1], [], []>, precision = #tpu.contract_precision<fp32>} : vector<4x50xf32>, vector<50x256xf32>, vector<4x256xf32> -> vector<4x256xf32>
    %cst_9 = arith.constant 1.000000e-30 : f32
    %10 = vector.broadcast %cst_9 : f32 to vector<4x256xf32>
    %11 = arith.maximumf %9, %10 : vector<4x256xf32>
    %c0_10 = arith.constant 0 : index
    %c0_11 = arith.constant 0 : index
    %12 = vector.load %arg6[%c0_10, %c0_11] : memref<4x1xf32, #tpu.memory_space<vmem>>, vector<4x1xf32>
    %13 = math.log %11 : vector<4x256xf32>
    %14 = vector.broadcast %12 : vector<4x1xf32> to vector<4x256xf32>
    %15 = arith.mulf %14, %13 : vector<4x256xf32>
    %16 = math.exp %15 : vector<4x256xf32>
    %c0_12 = arith.constant 0 : index
    %c0_13 = arith.constant 0 : index
    %17 = vector.load %arg5[%c0_12, %c0_13] : memref<12x4xf32, #tpu.memory_space<vmem>>, vector<12x4xf32>
    %cst_14 = arith.constant dense<0.000000e+00> : vector<12x256xf32>
    %18 = tpu.matmul %17, %16, %cst_14 {dimension_numbers = #tpu.dot_dimension_numbers<[1], [0], [0], [1], [0, 0, 1, 1], [], []>, precision = #tpu.contract_precision<fp32>} : vector<12x4xf32>, vector<4x256xf32>, vector<12x256xf32> -> vector<12x256xf32>
    %19 = arith.addf %18, %6 : vector<12x256xf32>
    %cst_15 = arith.constant 9.99999974E-6 : f32
    %20 = vector.broadcast %cst_15 : f32 to vector<12x256xf32>
    %21 = arith.addf %19, %20 : vector<12x256xf32>
    %22 = tpu.reciprocal %21 {approx = true} : vector<12x256xf32> -> vector<12x256xf32>
    %23 = arith.mulf %21, %22 : vector<12x256xf32>
    %cst_16 = arith.constant 2.000000e+00 : f32
    %24 = vector.broadcast %cst_16 : f32 to vector<12x256xf32>
    %25 = arith.subf %24, %23 : vector<12x256xf32>
    %26 = arith.mulf %22, %25 : vector<12x256xf32>
    %27 = arith.mulf %21, %26 : vector<12x256xf32>
    %cst_17 = arith.constant 2.000000e+00 : f32
    %28 = vector.broadcast %cst_17 : f32 to vector<12x256xf32>
    %29 = arith.subf %28, %27 : vector<12x256xf32>
    %30 = arith.mulf %26, %29 : vector<12x256xf32>
    %31 = arith.mulf %6, %30 : vector<12x256xf32>
    %cst_18 = arith.constant 5.000000e-01 : f32
    %32 = vector.broadcast %cst_18 : f32 to vector<12x256xf32>
    %33 = arith.subf %31, %32 : vector<12x256xf32>
    %c0_19 = arith.constant 0 : index
    %c0_20 = arith.constant 0 : index
    %34 = vector.load %arg7[%c0_19, %c0_20] : memref<12x256xf32, #tpu.memory_space<vmem>>, vector<12x256xf32>
    tpu.vector_store %arg7[%c0_19, %c0_20], %33 {strides = array<i32>} : memref<12x256xf32, #tpu.memory_space<vmem>>, vector<12x256xf32>,
    return
  }
  func.func @transform_0(%arg0: i32) -> (i32, i32) {
    %c0_i32 = arith.constant 0 : i32
    %c0_i32_0 = arith.constant 0 : i32
    %c0_i32_1 = arith.constant 0 : i32
    return %c0_i32, %c0_i32_0 : i32, i32
  }
  func.func @transform_1(%arg0: i32) -> (i32, i32) {
    %c0_i32 = arith.constant 0 : i32
    %c0_i32_0 = arith.constant 0 : i32
    %c0_i32_1 = arith.constant 0 : i32
    return %c0_i32, %c0_i32_0 : i32, i32
  }
  func.func @transform_2(%arg0: i32) -> (i32, i32) {
    %c0_i32 = arith.constant 0 : i32
    %c0_i32_0 = arith.constant 0 : i32
    %c0_i32_1 = arith.constant 0 : i32
    return %c0_i32, %c0_i32_0 : i32, i32
  }
  func.func @transform_3(%arg0: i32) -> (i32, i32) {
    %c0_i32 = arith.constant 0 : i32
    %c0_i32_0 = arith.constant 0 : i32
    %c0_i32_1 = arith.constant 0 : i32
    return %c0_i32, %c0_i32_0 : i32, i32
  }
  func.func @transform_4(%arg0: i32) -> (i32, i32) {
    %c0_i32 = arith.constant 0 : i32
    %c0_i32_0 = arith.constant 0 : i32
    %c0_i32_1 = arith.constant 0 : i32
    return %c0_i32, %c0_i32_0 : i32, i32
  }
  func.func @transform_5(%arg0: i32) -> (i32, i32) {
    %c0_i32 = arith.constant 0 : i32
    %c0_i32_0 = arith.constant 0 : i32
    %c0_i32_1 = arith.constant 0 : i32
    return %c0_i32, %c0_i32_0 : i32, i32
  }
  func.func @transform_6(%arg0: i32) -> (i32, i32) {
    %c0_i32 = arith.constant 0 : i32
    %c0_i32_0 = arith.constant 0 : i32
    %c0_i32_1 = arith.constant 0 : i32
    return %c0_i32, %c0_i32_0 : i32, i32
  }
}

</mosaic_0001>

<bundles_post_ra>
// kernel: tpu_custom_call.1
= control target key start
LH: loop header
LB: loop body
LE: loop exit
PB: predicated region body
PF: predicated region fallthrough
CT: control target
= control target key end

     0   :  { %11 = vsyncpa [#allocation3], 0  ;;  %s2321_s0 = inlined_call_operand.vmem [shape: f32[6,256], index: 0, kind: input, shape index: {}]   ;;  %s2322_s1 = inlined_call_operand.hbm [shape: f32[50,256], index: 1, kind: input, shape index: {}]   ;;  %s2323_s2 = inlined_call_operand.vmem [shape: f32[4,50], index: 2, kind: input, shape index: {}]   ;;  %s2324_s3 = inlined_call_operand.vmem [shape: f32[12,6], index: 3, kind: input, shape index: {}]   ;;  %s2325_s4 = inlined_call_operand.vmem [shape: f32[12,4], index: 4, kind: input, shape index: {}]   ;;  %s2326_s5 = inlined_call_operand.vmem [shape: f32[4,1], index: 5, kind: input, shape index: {}]   ;;  %s2327_s6 = inlined_call_operand.hbm [shape: f32[12,256], index: 6, kind: output, shape index: {}]  }
   0x1   :  { %12 = vsyncpa [#allocation4], 0  ;;  %s1923_s21 = smov [#allocation2]  }
   0x2   :  { %s20_s22 = sshll.u32 %s1923_s21, 4  ;;  %s21_s22 = int_to_ptr.vmem [resolvable:$true] %s20_s22 }
   0x3   :  { %s1887_s23 = scalar_lea.vmem %s21_s22, 1792  ;;  %p1892_p1 = scmp.lt.s32.totalorder %s21_s22, %s21_s22 }
   0x4   :  { %p1888_p0 = scmp.ne.s32.totalorder %s21_s22, %s1887_s23  ;;  %p1893_p2 = scmp.lt.s32.totalorder %s1887_s23, %s1887_s23 }
   0x6   :  { %p1894_p3 = por %p1893_p2, %p1892_p1 }
   0x8   :  { %p1895_p4 = pnand %p1894_p3, %p1888_p0 }
   0xa   :  { %1898 = shalt.err (!%p1895_p4)
}
   0xb   :  { %s1924_s24 = smov 256   ;;  %s1925_s25 = smov 16  }
   0xc   :  { %26 = dma.hbm_to_vmem [thread:$0]  %s2322_s1, 1792, %s21_s22, [#allocation3], %s1924_s24, %s1924_s24, %s1925_s25  }
   0xd   :  { %1919 = dma.done.wait [#allocation3], 1792  }
   0xe   :  { %1920 = vsyncadd [#allocation3], 4294965504  ;;  %v1926_v0 = vmov 0.0   ;;  %v1927_v1 = vmov 0   ;;  %vm48_vm0 = vcmask 48128   ;;  %v46_v4 = vld [vmem:[%s2324_s3] sm:$0xff] }
   0xf   :  { %128 = vmatprep.mubr.f32.mxu0 %v1926_v0  ;;  %225 = vmatprep.mubr.f32.mxu1 %v1926_v0  ;;  %v39_v2 = vld [vmem:[%s2321_s0 + $0x8] sm:$0x3f]  ;;  %v38_v3 = vld [vmem:[%s2321_s0] sm:$0x3f]  ;;  %v50_v7 = vsel %vm48_vm0, %v46_v4, 0  ;;  %vm55_vm1 = vcmask 1045504  }
  0x10   :  { %1850 = vset.pattern.permute.xlu0 %v1927_v1  ;;  %v41_v5 = vmax.f32 %v39_v2, 1e-30  ;;  %v40_v6 = vmax.f32 %v38_v3, 1e-30  ;;  %v47_v8 = vld [vmem:[%s2324_s3 + $0x8] sm:$0xf] }
  0x11   :  { %v1984_v9 = vand.u32 4294901760, %v50_v7  ;;  %v53_v10 = vsel %vm48_vm0, %v47_v8, 0  ;;  %v1233_v13 = vld [vmem:[%s2326_s5] sm:$0xf]  ;;  %v598_v28 = vld [vmem:[#allocation2 + $0x68] sm:$0x3] }
  0x12   :  { %1851 = vlog2.f32 %v41_v5  ;;  %v1989_v12 = vand.u32 4294901760, %v53_v10  ;;  %1240 = vperm.xlu0 %1850, %v1233_v13   ;;  %vm603_vm2 = vcmask 1041408   ;;  %v597_v31 = vld [vmem:[#allocation2 + $0x60] sm:$0x3]  ;;  %v596_v40 = vld [vmem:[#allocation2 + $0x58] sm:$0xff]  ;;  %v595_v42 = vld [vmem:[#allocation2 + $0x50] sm:$0xff] }
  0x13   :  { %1853 = vlog2.f32 %v40_v6  ;;  %v1987_v11 = vsub.f32 %v50_v7, %v1984_v9  ;;  %v608_v34 = vsel %vm603_vm2, %v598_v28, 0  ;;  %v605_v37 = vsel %vm603_vm2, %v597_v31, 0  ;;  %v594_v46 = vld [vmem:[#allocation2 + $0x48] sm:$0xff]  ;;  %v584_v47 = vld [vmem:[%s2323_s2] sm:$0xf]  ;;  %v592_v51 = vld [vmem:[#allocation2 + $0x38] sm:$0xff] }
  0x14   :  { %v1996_v15 = vsub.f32 %v53_v10, %v1989_v12  ;;  %v2012_v39 = vand.u32 4294901760, %v608_v34  ;;  %v2015_v44 = vand.u32 4294901760, %v605_v37  ;;  %v2017_v45 = vand.u32 4294901760, %v596_v40  ;;  %v593_v49 = vld [vmem:[#allocation2 + $0x40] sm:$0xff]  ;;  %v591_v54 = vld [vmem:[#allocation2 + $0x30] sm:$0xff]  ;;  %v590_v61 = vld [vmem:[#allocation2 + $0x28] sm:$0xff] }
  0x15   :  { %v131_v14 = vand.u32 4294901760, %v1987_v11  ;;  %vm599_vm3 = vcmask 408576   ;;  %v2022_v48 = vand.u32 4294901760, %v595_v42  ;;  %v2033_v53 = vand.u32 4294901760, %v594_v46  ;;  %v589_v57 = vld [vmem:[#allocation2 + $0x20] sm:$0xff]  ;;  %v588_v4 = vld [vmem:[#allocation2 + $0x18] sm:$0xff] }
  0x16   :  { %v142_v18 = vand.u32 4294901760, %v1996_v15  ;;  %v2025_v50 = vsub.f32 %v608_v34, %v2012_v39  ;;  %v2031_v52 = vsub.f32 %v605_v37, %v2015_v44  ;;  %v601_v55 = vsel %vm599_vm3, %v584_v47, 0  ;;  %v587_v10 = vld [vmem:[#allocation2 + $0x10] sm:$0xff] }
  0x17   :  { %v132_v17 = vsub.f32 %v1987_v11, %v131_v14  ;;  %v2037_v56 = vand.u32 4294901760, %v593_v49  ;;  %v2040_v58 = vsub.f32 %v596_v40, %v2017_v45  ;;  %v2043_v59 = vsub.f32 %v595_v42, %v2022_v48 }
  0x18   :  { %v143_v26 = vsub.f32 %v1996_v15, %v142_v18  ;;  %v2045_v60 = vand.u32 4294901760, %v592_v51  ;;  %v720_v62 = vand.u32 4294901760, %v2025_v50  ;;  %v2050_v63 = vand.u32 4294901760, %v591_v54 }
  0x19   :  { %v133_v25 = vand.u32 4294901760, %v132_v17  ;;  %v2052_v1 = vand.u32 4294901760, %v601_v55  ;;  %v2056_v2 = vand.u32 4294901760, %v589_v57  ;;  %v726_v3 = vand.u32 4294901760, %v2031_v52  ;;  %v586_v17 = vld [vmem:[#allocation2 + $0x8] sm:$0xff] }
  0x1a   :  { %v144_v32 = vand.u32 4294901760, %v143_v26  ;;  %v2060_v5 = vsub.f32 %v594_v46, %v2033_v53  ;;  %v2064_v6 = vsub.f32 %v593_v49, %v2037_v56  ;;  %v2066_v7 = vand.u32 4294901760, %v590_v61 }
  0x1b   :  { %v732_v8 = vand.u32 4294901760, %v2040_v58  ;;  %v721_v13 = vsub.f32 %v2025_v50, %v720_v62  ;;  %v2103_v28 = vand.u32 4294901760, %v586_v17  ;;  %vm1251_vm4 = vcmask 31744  }
  0x1c   :  { %vm1258_vm5 = vcmask 1043456  }
  0x1d   :  { %v733_v26 = vsub.f32 %v2040_v58, %v732_v8  ;;  %v722_v31 = vand.u32 4294901760, %v721_v13  ;;  %v2140_v42 = vsub.f32 %v586_v17, %v2103_v28 }
  0x1f   :  { %v1852_v16 = vpop.eup %1851 }
  0x20   :  { %v1854_v19 = vpop.eup %1853  ;;  %v45_v20 = vmul.f32 0.6931472, %v1852_v16  ;;  %v738_v16 = vand.u32 4294901760, %v2043_v59 }
  0x21   :  { %v43_v21 = vmul.f32 0.6931472, %v1854_v19  ;;  %v2074_v19 = vsub.f32 %v592_v51, %v2045_v60 }
  0x22   :  { %v60_v22 = vsel %vm55_vm1, %v45_v20, 0  ;;  %v2080_v20 = vsub.f32 %v591_v54, %v2050_v63 }
  0x23   :  { %v92_v23 = vand.u32 4294901760, %v60_v22  ;;  %v57_v24 = vsel %vm55_vm1, %v43_v21, 0  ;;  %v2082_v21 = vand.u32 4294901760, %v588_v4 }
  0x24   :  { %v2005_v27 = vand.u32 4294901760, %v57_v24 }
  0x25   :  { %93 = vmatprep.subr.mxu0 %v92_v23  ;;  %v182_v29 = vsub.f32 %v60_v22, %v92_v23  ;;  %v585_v22 = vld [vmem:[#allocation2] sm:$0xff] }
  0x26   :  { %95 = vmatpush1.msra.mxu0 %v2005_v27  ;;  %v188_v30 = vsub.f32 %v57_v24, %v2005_v27  ;;  %v2090_v24 = vsub.f32 %v589_v57, %v2056_v2 }
  0x27   :  { %134 = vmatmul.mubr.f32.vlgmr.msra.gmra.mxu0 %v133_v25  ;;  %v183_v33 = vand.u32 4294901760, %v182_v29  ;;  %272 = vmatprep.subr.mxu0 %v182_v29  ;;  %v744_v25 = vand.u32 4294901760, %v2060_v5 }
  0x28   :  { %139 = vmatprep.mubr.f32.mxu0 %v1926_v0  ;;  %v189_v35 = vand.u32 4294901760, %v188_v30  ;;  %275 = vmatpush1.msra.mxu0 %v188_v30  ;;  %v774_v49 = vand.u32 4294901760, %v2090_v24 }
  0x29   :  { %v184_v36 = vsub.f32 %v182_v29, %v183_v33  ;;  %443 = vmatprep.subr.mxu0 %v183_v33  ;;  %v750_v29 = vand.u32 4294901760, %v2064_v6  ;;  %v756_v33 = vand.u32 4294901760, %v2074_v19 }
  0x2a   :  { %v190_v38 = vsub.f32 %v188_v30, %v189_v35  ;;  %v2107_v30 = vsub.f32 %v590_v61, %v2066_v7  ;;  %v775_v17 = vsub.f32 %v2090_v24, %v774_v49 }
  0x2b   :  { %145 = vmatmul.mubr.f32.gmra.mxu0 %v144_v32  ;;  %v185_v41 = vand.u32 4294901760, %v184_v36  ;;  %v2114_v32 = vand.u32 4294901760, %v585_v22  ;;  %v751_v40 = vsub.f32 %v2064_v6, %v750_v29  ;;  %v757_v47 = vsub.f32 %v2074_v19, %v756_v33 }
  0x2c   :  { %v191_v43 = vand.u32 4294901760, %v190_v38  ;;  %308 = vmatprep.mubr.f32.mxu0 %v1926_v0  ;;  %v745_v38 = vsub.f32 %v2060_v5, %v744_v25 }
  0x2d   :  { %186 = vmatprep.subr.mxu1 %v185_v41  ;;  %v768_v41 = vand.u32 4294901760, %v2107_v30  ;;  %v2144_v46 = vsub.f32 %v585_v22, %v2114_v32  ;;  %v758_v13 = vand.u32 4294901760, %v757_v47 }
  0x2e   :  { %192 = vmatpush1.msra.mxu1 %v191_v43 }
  0x2f   :  { %227 = vmatmul.mubr.f32.vlgmr.msra.gmra.mxu1 %v1984_v9  ;;  %311 = vmatmul.mubr.f32.vlgmr.msra.gmra.mxu0 %v1987_v11  ;;  %v727_v11 = vsub.f32 %v2031_v52, %v726_v3  ;;  %v798_v22 = vand.u32 4294901760, %v2144_v46 }
  0x30   :  { %356 = vmatprep.subr.mxu1 %v92_v23  ;;  %232 = vmatprep.mubr.f32.mxu1 %v1926_v0 }
  0x31   :  { %316 = vmatprep.mubr.f32.mxu0 %v1926_v0  ;;  %358 = vmatpush1.msra.mxu1 %v2005_v27  ;;  %v728_v36 = vand.u32 4294901760, %v727_v11 }
  0x32   :  { %447 = vmatpush1.msra.mxu0 %v189_v35  ;;  %526 = vmatprep.subr.mxu1 %v92_v23  ;;  %v2085_v23 = vsub.f32 %v601_v55, %v2052_v1  ;;  %v2122_v35 = vsub.f32 %v588_v4, %v2082_v21  ;;  %v746_v55 = vand.u32 4294901760, %v745_v38  ;;  %v769_v4 = vsub.f32 %v2107_v30, %v768_v41 }
  0x33   :  { %234 = vmatmul.mubr.f32.gmra.mxu1 %v1989_v12  ;;  %319 = vmatmul.mubr.f32.gmra.mxu0 %v1996_v15  ;;  %v762_v15 = vand.u32 4294901760, %v2080_v20 }
  0x34   :  { %391 = vmatprep.mubr.f32.mxu1 %v1926_v0  ;;  %480 = vmatprep.mubr.f32.mxu0 %v1926_v0  ;;  %v691_v34 = vand.u32 4294901760, %v2085_v23  ;;  %v780_v54 = vand.u32 4294901760, %v2122_v35 }
  0x35   :  { %629 = vmatprep.subr.mxu0 %v2012_v39  ;;  %v763_v57 = vsub.f32 %v2080_v20, %v762_v15 }
  0x36   :  { %v692_v51 = vsub.f32 %v2085_v23, %v691_v34 }
  0x37   :  { %395 = vmatmul.mubr.f32.vlgmr.msra.gmra.mxu1 %v131_v14  ;;  %482 = vmatmul.mubr.f32.vlgmr.msra.gmra.mxu0 %v1984_v9  ;;  %v2095_v14 = vand.u32 4294901760, %v587_v10 }
  0x38   :  { %631 = vmatpush1.msra.mxu0 %v2015_v44  ;;  %400 = vmatprep.mubr.f32.mxu1 %v1926_v0  ;;  %v693_v11 = vand.u32 4294901760, %v692_v51 }
  0x39   :  { %633 = vmatprep.subr.mxu0 %v2017_v45  ;;  %528 = vmatpush1.msra.mxu1 %v2005_v27  ;;  %v739_v27 = vsub.f32 %v2043_v59, %v738_v16  ;;  %v2127_v37 = vsub.f32 %v587_v10, %v2095_v14  ;;  %v792_v10 = vand.u32 4294901760, %v2140_v42 }
  0x3a   :  { %635 = vmatpush1.msra.mxu0 %v2022_v48  ;;  %487 = vmatprep.mubr.f32.mxu0 %v1926_v0 }
  0x3b   :  { %637 = vmatprep.subr.mxu0 %v2033_v53  ;;  %404 = vmatmul.mubr.f32.gmra.mxu1 %v142_v18  ;;  %v734_v18 = vand.u32 4294901760, %v733_v26  ;;  %v740_v43 = vand.u32 4294901760, %v739_v27  ;;  %v786_v61 = vand.u32 4294901760, %v2127_v37  ;;  %v781_v26 = vsub.f32 %v2122_v35, %v780_v54 }
  0x3c   :  { %639 = vmatpush1.msra.mxu0 %v2037_v56  ;;  %561 = vmatprep.mubr.f32.mxu1 %v1926_v0  ;;  %v793_v38 = vsub.f32 %v2140_v42, %v792_v10 }
  0x3d   :  { %641 = vmatprep.subr.mxu0 %v2045_v60  ;;  %489 = vmatmul.mubr.f32.gmra.mxu0 %v1989_v12  ;;  %v787_v27 = vsub.f32 %v2127_v37, %v786_v61 }
  0x3e   :  { %643 = vmatpush1.msra.mxu0 %v2050_v63  ;;  %723 = vmatprep.subr.mxu1 %v722_v31  ;;  %v764_v31 = vand.u32 4294901760, %v763_v57  ;;  %v794_v47 = vand.u32 4294901760, %v793_v38 }
  0x3f   :  { %645 = vmatprep.subr.mxu0 %v2066_v7  ;;  %563 = vmatmul.mubr.f32.vlgmr.msra.gmra.mxu1 %v1984_v9  ;;  %v752_v9 = vand.u32 4294901760, %v751_v40  ;;  %v782_v40 = vand.u32 4294901760, %v781_v26 }
  0x40   :  { %647 = vmatpush1.msra.mxu0 %v2056_v2  ;;  %729 = vmatpush1.msra.mxu1 %v728_v36  ;;  %v770_v36 = vand.u32 4294901760, %v769_v4 }
  0x41   :  { %649 = vmatprep.subr.mxu0 %v2082_v21  ;;  %735 = vmatprep.subr.mxu1 %v734_v18  ;;  %v776_v18 = vand.u32 4294901760, %v775_v17 }
  0x42   :  { %651 = vmatpush1.msra.mxu0 %v2095_v14  ;;  %741 = vmatpush1.msra.mxu1 %v740_v43  ;;  %v788_v43 = vand.u32 4294901760, %v787_v27 }
  0x43   :  { %568 = vmatprep.mubr.f32.mxu1 %v1926_v0  ;;  %653 = vmatprep.subr.mxu0 %v2103_v28 }
  0x44   :  { %747 = vmatprep.subr.mxu1 %v746_v55  ;;  %570 = vmatmul.mubr.f32.gmra.mxu1 %v1989_v12  ;;  %v799_v12 = vsub.f32 %v2144_v46, %v798_v22 }
  0x45   :  { %655 = vmatpush1.msra.mxu0 %v2114_v32  ;;  %753 = vmatpush1.msra.mxu1 %v752_v9 }
  0x46   :  { %688 = vmatprep.mubr.f32.mxu0 %v1926_v0  ;;  %759 = vmatprep.subr.mxu1 %v758_v13  ;;  %v800_v51 = vand.u32 4294901760, %v799_v12 }
  0x47   :  { %862 = vmatprep.subr.mxu0 %v2025_v50  ;;  %694 = vmatmul.mubr.f32.vlgmr.msra.gmra.mxu0 %v693_v11 }
  0x48   :  { %765 = vmatpush1.msra.mxu1 %v764_v31  ;;  %865 = vmatpush1.msra.mxu0 %v2031_v52 }
  0x49   :  { %771 = vmatprep.subr.mxu1 %v770_v36  ;;  %868 = vmatprep.subr.mxu0 %v2040_v58 }
  0x4a   :  { %777 = vmatpush1.msra.mxu1 %v776_v18  ;;  %871 = vmatpush1.msra.mxu0 %v2043_v59 }
  0x4b   :  { %783 = vmatprep.subr.mxu1 %v782_v40  ;;  %874 = vmatprep.subr.mxu0 %v2060_v5 }
  0x4c   :  { %789 = vmatpush1.msra.mxu1 %v788_v43  ;;  %877 = vmatpush1.msra.mxu0 %v2064_v6 }
  0x4d   :  { %795 = vmatprep.subr.mxu1 %v794_v47  ;;  %880 = vmatprep.subr.mxu0 %v2074_v19 }
  0x4e   :  { %801 = vmatpush1.msra.mxu1 %v800_v51  ;;  %834 = vmatprep.mubr.f32.mxu1 %v1926_v0 }
  0x4f   :  { %883 = vmatpush1.msra.mxu0 %v2080_v20  ;;  %836 = vmatmul.mubr.f32.vlgmr.msra.gmra.mxu1 %v2052_v1 }
  0x50   :  { %886 = vmatprep.subr.mxu0 %v2107_v30  ;;  %962 = vmatprep.subr.mxu1 %v2012_v39 }
  0x51   :  { %889 = vmatpush1.msra.mxu0 %v2090_v24  ;;  %964 = vmatpush1.msra.mxu1 %v2015_v44 }
  0x52   :  { %892 = vmatprep.subr.mxu0 %v2122_v35  ;;  %966 = vmatprep.subr.mxu1 %v2017_v45 }
  0x53   :  { %895 = vmatpush1.msra.mxu0 %v2127_v37  ;;  %968 = vmatpush1.msra.mxu1 %v2022_v48 }
  0x54   :  { %898 = vmatprep.subr.mxu0 %v2140_v42  ;;  %970 = vmatprep.subr.mxu1 %v2033_v53 }
  0x55   :  { %901 = vmatpush1.msra.mxu0 %v2144_v46  ;;  %934 = vmatprep.mubr.f32.mxu0 %v1926_v0 }
  0x56   :  { %972 = vmatpush1.msra.mxu1 %v2037_v56  ;;  %937 = vmatmul.mubr.f32.vlgmr.msra.gmra.mxu0 %v2085_v23 }
  0x57   :  { %974 = vmatprep.subr.mxu1 %v2045_v60  ;;  %1052 = vmatprep.subr.mxu0 %v720_v62 }
  0x58   :  { %976 = vmatpush1.msra.mxu1 %v2050_v63  ;;  %1056 = vmatpush1.msra.mxu0 %v726_v3 }
  0x59   :  { %978 = vmatprep.subr.mxu1 %v2066_v7  ;;  %1060 = vmatprep.subr.mxu0 %v732_v8 }
  0x5a   :  { %980 = vmatpush1.msra.mxu1 %v2056_v2  ;;  %1064 = vmatpush1.msra.mxu0 %v738_v16 }
  0x5b   :  { %982 = vmatprep.subr.mxu1 %v2082_v21  ;;  %1068 = vmatprep.subr.mxu0 %v744_v25 }
  0x5c   :  { %984 = vmatpush1.msra.mxu1 %v2095_v14  ;;  %1072 = vmatpush1.msra.mxu0 %v750_v29 }
  0x5d   :  { %986 = vmatprep.subr.mxu1 %v2103_v28  ;;  %1076 = vmatprep.subr.mxu0 %v756_v33 }
  0x5e   :  { %988 = vmatpush1.msra.mxu1 %v2114_v32  ;;  %1021 = vmatprep.mubr.f32.mxu1 %v1926_v0 }
  0x5f   :  { %1080 = vmatpush1.msra.mxu0 %v762_v15  ;;  %1025 = vmatmul.mubr.f32.vlgmr.msra.gmra.mxu1 %v691_v34 }
  0x60   :  { %1084 = vmatprep.subr.mxu0 %v768_v41  ;;  %1164 = vmatprep.subr.mxu1 %v2012_v39 }
  0x61   :  { %1088 = vmatpush1.msra.mxu0 %v774_v49  ;;  %1166 = vmatpush1.msra.mxu1 %v2015_v44 }
  0x62   :  { %1092 = vmatprep.subr.mxu0 %v780_v54  ;;  %1168 = vmatprep.subr.mxu1 %v2017_v45 }
  0x63   :  { %1096 = vmatpush1.msra.mxu0 %v786_v61  ;;  %1170 = vmatpush1.msra.mxu1 %v2022_v48 }
  0x64   :  { %1100 = vmatprep.subr.mxu0 %v792_v10  ;;  %1172 = vmatprep.subr.mxu1 %v2033_v53 }
  0x65   :  { %1104 = vmatpush1.msra.mxu0 %v798_v22  ;;  %1137 = vmatprep.mubr.f32.mxu0 %v1926_v0 }
  0x66   :  { %1174 = vmatpush1.msra.mxu1 %v2037_v56  ;;  %1139 = vmatmul.mubr.f32.vlgmr.msra.gmra.mxu0 %v2052_v1 }
  0x67   :  { %1176 = vmatprep.subr.mxu1 %v2045_v60  ;;  %1223 = vmatprep.mubr.f32.mxu1 %v1926_v0 }
  0x68   :  { %1178 = vmatpush1.msra.mxu1 %v2050_v63  ;;  %1331 = vmatprep.mubr.f32.mxu0 %v1926_v0 }
  0x69   :  { %1180 = vmatprep.subr.mxu1 %v2066_v7 }
  0x6a   :  { %1182 = vmatpush1.msra.mxu1 %v2056_v2 }
  0x6b   :  { %1184 = vmatprep.subr.mxu1 %v2082_v21 }
  0x6c   :  { %1186 = vmatpush1.msra.mxu1 %v2095_v14 }
  0x6d   :  { %1188 = vmatprep.subr.mxu1 %v2103_v28 }
  0x6e   :  { %1190 = vmatpush1.msra.mxu1 %v2114_v32 }
  0x6f   :  { %1225 = vmatmul.mubr.f32.vlgmr.msra.gmra.mxu1 %v2052_v1 }
  0x70   :  { %1428 = vmatprep.mubr.f32.mxu1 %v1926_v0 }
  0xe7   :  { %v135_v39 = vpop.f32.mrf.mxu0 }
  0xe9   :  { %v137_v44 = vpop.f32.mrf.mxu0 }
  0xeb   :  { %v146_v45 = vpop.f32.mrf.mxu0 }
  0xed   :  { %v148_v48 = vpop.f32.mrf.mxu0 }
  0xef   :  { %v228_v50 = vpop.f32.mrf.mxu1  ;;  %v312_v52 = vpop.f32.mrf.mxu0 }
  0xf0   :  { %v229_v53 = vadd.f32 %v228_v50, %v135_v39 }
  0xf1   :  { %v230_v56 = vpop.f32.mrf.mxu1  ;;  %v314_v58 = vpop.f32.mrf.mxu0 }
  0xf2   :  { %v231_v59 = vadd.f32 %v230_v56, %v137_v44  ;;  %v313_v60 = vadd.f32 %v312_v52, %v229_v53  ;;  %v1241_v53 = vpop.permute.xlu0 %1240 }
  0xf3   :  { %v235_v62 = vpop.f32.mrf.mxu1  ;;  %v320_v63 = vpop.f32.mrf.mxu0 }
  0xf4   :  { %v236_v2 = vadd.f32 %v235_v62, %v146_v45  ;;  %v315_v3 = vadd.f32 %v314_v58, %v231_v59  ;;  %v1249_v59 = vld [vmem:[%s2325_s4] sm:$0xff] }
  0xf5   :  { %v237_v5 = vpop.f32.mrf.mxu1  ;;  %v322_v6 = vpop.f32.mrf.mxu0 }
  0xf6   :  { %v238_v1 = vadd.f32 %v237_v5, %v148_v48  ;;  %v321_v7 = vadd.f32 %v320_v63, %v236_v2  ;;  %v1250_v5 = vld [vmem:[%s2325_s4 + $0x8] sm:$0xf]  ;;  %s1928_s4 = smov [#allocation5]  }
  0xf7   :  { %v396_v8 = vpop.f32.mrf.mxu1  ;;  %v483_v16 = vpop.f32.mrf.mxu0  ;;  %s1828_s15 = sshll.u32 %s1928_s4, 4  ;;  %s1829_s15 = int_to_ptr.vmem [resolvable:$true] %s1828_s15 }
  0xf8   :  { %v323_v19 = vadd.f32 %v322_v6, %v238_v1  ;;  %v397_v20 = vadd.f32 %v396_v8, %v313_v60  ;;  %s1899_s16 = scalar_lea.vmem %s1829_s15, 512  ;;  %p1904_p6 = scmp.lt.s32.totalorder %s1829_s15, %s1829_s15 }
  0xf9   :  { %v398_v21 = vpop.f32.mrf.mxu1  ;;  %v485_v23 = vpop.f32.mrf.mxu0  ;;  %p1900_p5 = scmp.ne.s32.totalorder %s1829_s15, %s1899_s16  ;;  %p1905_p7 = scmp.lt.s32.totalorder %s1899_s16, %s1899_s16 }
  0xfa   :  { %v399_v24 = vadd.f32 %v398_v21, %v315_v3  ;;  %v484_v14 = vadd.f32 %v483_v16, %v397_v20  ;;  %v1253_v3 = vsel %vm1251_vm4, %v1249_v59, 0 }
  0xfb   :  { %v405_v25 = vpop.f32.mrf.mxu1  ;;  %v1332_v1 = vand.u32 4294901760, %v1253_v3  ;;  %p1906_p8 = por %p1905_p7, %p1904_p6 }
  0xfc   :  { %v406_v28 = vadd.f32 %v405_v25, %v321_v7  ;;  %v486_v29 = vadd.f32 %v485_v23, %v399_v24  ;;  %v1256_v7 = vsel %vm1251_vm4, %v1250_v5, 0 }
  0xfd   :  { %v407_v30 = vpop.f32.mrf.mxu1  ;;  %v490_v32 = vpop.f32.mrf.mxu0  ;;  %v1333_v8 = vsub.f32 %v1253_v3, %v1332_v1  ;;  %v1343_v16 = vand.u32 4294901760, %v1256_v7  ;;  %p1907_p9 = pnand %p1906_p8, %p1900_p5 }
  0xfe   :  { %v408_v33 = vadd.f32 %v407_v30, %v323_v19  ;;  %v491_v34 = vadd.f32 %v490_v32, %v406_v28 }
  0xff   :  { %v492_v35 = vpop.f32.mrf.mxu0  ;;  %v564_v37 = vpop.f32.mrf.mxu1  ;;  %v1334_v19 = vand.u32 4294901760, %v1333_v8  ;;  %v1344_v20 = vsub.f32 %v1256_v7, %v1343_v16 }
 0x100   :  { %v493_v15 = vadd.f32 %v492_v35, %v408_v33  ;;  %v2271_v41 = vadd.f32 %v564_v37, %v484_v14 }
 0x101   :  { %v566_v42 = vpop.f32.mrf.mxu1  ;;  %v1335_v23 = vsub.f32 %v1333_v8, %v1334_v19  ;;  %v1345_v24 = vand.u32 4294901760, %v1344_v20 }
 0x102   :  { %v2273_v46 = vadd.f32 %v566_v42, %v486_v29 }
 0x103   :  { %v1336_v32 = vand.u32 4294901760, %v1335_v23 }
 0x104   :  { %v571_v49 = vpop.f32.mrf.mxu1 }
 0x105   :  { %v2275_v54 = vadd.f32 %v571_v49, %v491_v34  ;;  %v1346_v34 = vsub.f32 %v1344_v20, %v1345_v24 }
 0x106   :  { %v573_v55 = vpop.f32.mrf.mxu1 }
 0x107   :  { %v2277_v57 = vadd.f32 %v573_v55, %v493_v15  ;;  %v695_v61 = vpop.f32.mrf.mxu0  ;;  %v1347_v42 = vand.u32 4294901760, %v1346_v34 }
 0x109   :  { %v697_v9 = vpop.f32.mrf.mxu0 }
 0x10f   :  { %v837_v4 = vpop.f32.mrf.mxu1 }
 0x110   :  { %v838_v11 = vadd.f32 %v837_v4, %v695_v61  ;;  %v576_v4 = vmul.f32 1.442695, %v2271_v41 }
 0x111   :  { %v839_v13 = vpop.f32.mrf.mxu1 }
 0x112   :  { %v840_v31 = vadd.f32 %v839_v13, %v697_v9  ;;  %v580_v13 = vmul.f32 1.442695, %v2275_v54 }
 0x116   :  { %v938_v10 = vpop.f32.mrf.mxu0 }
 0x117   :  { %v939_v27 = vadd.f32 %v938_v10, %v838_v11  ;;  %v578_v10 = vmul.f32 1.442695, %v2273_v46 }
 0x118   :  { %v940_v17 = vpop.f32.mrf.mxu0 }
 0x119   :  { %v941_v38 = vadd.f32 %v940_v17, %v840_v31  ;;  %v582_v17 = vmul.f32 1.442695, %v2277_v57 }
 0x11f   :  { %v1026_v22 = vpop.f32.mrf.mxu1 }
 0x120   :  { %v1027_v18 = vadd.f32 %v1026_v22, %v939_v27 }
 0x121   :  { %v1028_v36 = vpop.f32.mrf.mxu1 }
 0x122   :  { %v1029_v40 = vadd.f32 %v1028_v36, %v941_v38 }
 0x126   :  { %v1140_v26 = vpop.f32.mrf.mxu0 }
 0x127   :  { %v1141_v43 = vadd.f32 %v1140_v26, %v1027_v18 }
 0x128   :  { %v1142_v12 = vpop.f32.mrf.mxu0 }
 0x129   :  { %v1143_v51 = vadd.f32 %v1142_v12, %v1029_v40 }
 0x12f   :  { %v1226_v47 = vpop.f32.mrf.mxu1 }
 0x130   :  { %v1227_v39 = vadd.f32 %v1226_v47, %v1141_v43 }
 0x131   :  { %v1228_v44 = vpop.f32.mrf.mxu1 }
 0x132   :  { %v1231_v45 = vmax.f32 %v1227_v39, 1e-30  ;;  %v1229_v48 = vadd.f32 %v1228_v44, %v1143_v51 }
 0x134   :  { %1855 = vlog2.f32 %v1231_v45  ;;  %v1232_v50 = vmax.f32 %v1229_v48, 1e-30 }
 0x136   :  { %1857 = vlog2.f32 %v1232_v50 }
 0x141   :  { %v1856_v52 = vpop.eup %1855 }
 0x142   :  { %v1235_v56 = vmul.f32 0.6931472, %v1856_v52 }
 0x143   :  { %v1858_v58 = vpop.eup %1857 }
 0x144   :  { %v1237_v60 = vmul.f32 0.6931472, %v1858_v58  ;;  %v1243_v62 = vmul.f32 %v1241_v53, %v1235_v56 }
 0x146   :  { %v1244_v63 = vmul.f32 %v1241_v53, %v1237_v60  ;;  %v1245_v2 = vmul.f32 1.442695, %v1243_v62 }
 0x148   :  { %1859 = vpow2.f32 %v1245_v2  ;;  %v1247_v6 = vmul.f32 1.442695, %v1244_v63 }
 0x14a   :  { %1861 = vpow2.f32 %v1247_v6 }
 0x14b   :  { %1863 = vpow2.f32 %v576_v4 }
 0x14c   :  { %1865 = vpow2.f32 %v578_v10 }
 0x14d   :  { %1867 = vpow2.f32 %v580_v13 }
 0x14e   :  { %1869 = vpow2.f32 %v582_v17 }
 0x155   :  { %v1860_v21 = vpop.eup %1859 }
 0x156   :  { %v1260_v14 = vsel %vm1258_vm5, %v1860_v21, 0 }
 0x157   :  { %v1862_v25 = vpop.eup %1861  ;;  %v1297_v28 = vand.u32 4294901760, %v1260_v14 }
 0x158   :  { %v1263_v29 = vsel %vm1258_vm5, %v1862_v25, 0 }
 0x159   :  { %v1295_v30 = vand.u32 4294901760, %v1263_v29  ;;  %v1391_v33 = vsub.f32 %v1260_v14, %v1297_v28 }
 0x15b   :  { %1296 = vmatprep.subr.mxu0 %v1295_v30  ;;  %v1385_v35 = vsub.f32 %v1263_v29, %v1295_v30  ;;  %v1392_v37 = vand.u32 4294901760, %v1391_v33 }
 0x15c   :  { %1298 = vmatpush1.msra.mxu0 %v1297_v28 }
 0x15d   :  { %1337 = vmatmul.mubr.f32.vlgmr.msra.gmra.mxu0 %v1336_v32  ;;  %1475 = vmatprep.subr.mxu0 %v1385_v35  ;;  %v1386_v15 = vand.u32 4294901760, %v1385_v35  ;;  %v1393_v49 = vsub.f32 %v1391_v33, %v1392_v37 }
 0x15e   :  { %1478 = vmatpush1.msra.mxu0 %v1391_v33  ;;  %1342 = vmatprep.mubr.f32.mxu0 %v1926_v0 }
 0x15f   :  { %1646 = vmatprep.subr.mxu0 %v1386_v15  ;;  %v1387_v55 = vsub.f32 %v1385_v35, %v1386_v15  ;;  %v1394_v9 = vand.u32 4294901760, %v1393_v49 }
 0x161   :  { %1348 = vmatmul.mubr.f32.gmra.mxu0 %v1347_v42  ;;  %v1388_v61 = vand.u32 4294901760, %v1387_v55 }
 0x162   :  { %1511 = vmatprep.mubr.f32.mxu0 %v1926_v0 }
 0x163   :  { %1389 = vmatprep.subr.mxu1 %v1388_v61 }
 0x164   :  { %1395 = vmatpush1.msra.mxu1 %v1394_v9 }
 0x165   :  { %1430 = vmatmul.mubr.f32.vlgmr.msra.gmra.mxu1 %v1332_v1  ;;  %1514 = vmatmul.mubr.f32.vlgmr.msra.gmra.mxu0 %v1333_v8 }
 0x166   :  { %1559 = vmatprep.subr.mxu1 %v1295_v30  ;;  %1650 = vmatpush1.msra.mxu0 %v1392_v37 }
 0x167   :  { %1561 = vmatpush1.msra.mxu1 %v1297_v28  ;;  %1435 = vmatprep.mubr.f32.mxu1 %v1926_v0 }
 0x168   :  { %1729 = vmatprep.subr.mxu1 %v1295_v30  ;;  %1519 = vmatprep.mubr.f32.mxu0 %v1926_v0 }
 0x169   :  { %1437 = vmatmul.mubr.f32.gmra.mxu1 %v1343_v16  ;;  %1522 = vmatmul.mubr.f32.gmra.mxu0 %v1344_v20 }
 0x16a   :  { %1594 = vmatprep.mubr.f32.mxu1 %v1926_v0  ;;  %1683 = vmatprep.mubr.f32.mxu0 %v1926_v0 }
 0x16d   :  { %1598 = vmatmul.mubr.f32.vlgmr.msra.gmra.mxu1 %v1334_v19  ;;  %1685 = vmatmul.mubr.f32.vlgmr.msra.gmra.mxu0 %v1332_v1 }
 0x16e   :  { %1731 = vmatpush1.msra.mxu1 %v1297_v28  ;;  %1603 = vmatprep.mubr.f32.mxu1 %v1926_v0 }
 0x16f   :  { %1690 = vmatprep.mubr.f32.mxu0 %v1926_v0 }
 0x171   :  { %1607 = vmatmul.mubr.f32.gmra.mxu1 %v1345_v24  ;;  %1692 = vmatmul.mubr.f32.gmra.mxu0 %v1343_v16 }
 0x172   :  { %1764 = vmatprep.mubr.f32.mxu1 %v1926_v0 }
 0x175   :  { %1766 = vmatmul.mubr.f32.vlgmr.msra.gmra.mxu1 %v1332_v1 }
 0x176   :  { %1771 = vmatprep.mubr.f32.mxu1 %v1926_v0  ;;  %v2299_v0 = vpop.eup %1863 }
 0x177   :  { %v2302_v18 = vpop.eup %1865 }
 0x178   :  { %v2305_v43 = vpop.eup %1867 }
 0x179   :  { %1773 = vmatmul.mubr.f32.gmra.mxu1 %v1343_v16  ;;  %v2308_v45 = vpop.eup %1869 }
 0x21d   :  { %v1338_v22 = vpop.f32.mrf.mxu0 }
 0x21e   :  { %v1339_v46 = vadd.f32 %v2299_v0, %v1338_v22 }
 0x21f   :  { %v1340_v11 = vpop.f32.mrf.mxu0 }
 0x220   :  { %v1341_v57 = vadd.f32 %v2302_v18, %v1340_v11 }
 0x221   :  { %v1349_v26 = vpop.f32.mrf.mxu0 }
 0x222   :  { %v1350_v39 = vadd.f32 %v2305_v43, %v1349_v26 }
 0x223   :  { %v1351_v31 = vpop.f32.mrf.mxu0 }
 0x224   :  { %v1352_v52 = vadd.f32 %v2308_v45, %v1351_v31 }
 0x225   :  { %v1431_v27 = vpop.f32.mrf.mxu1  ;;  %v1515_v36 = vpop.f32.mrf.mxu0 }
 0x226   :  { %v1432_v40 = vadd.f32 %v1431_v27, %v1339_v46 }
 0x227   :  { %v1433_v38 = vpop.f32.mrf.mxu1  ;;  %v1517_v41 = vpop.f32.mrf.mxu0 }
 0x228   :  { %v1434_v44 = vadd.f32 %v1433_v38, %v1341_v57  ;;  %v1516_v53 = vadd.f32 %v1515_v36, %v1432_v40 }
 0x229   :  { %v1438_v54 = vpop.f32.mrf.mxu1  ;;  %v1523_v12 = vpop.f32.mrf.mxu0 }
 0x22a   :  { %v1439_v56 = vadd.f32 %v1438_v54, %v1350_v39  ;;  %v1518_v60 = vadd.f32 %v1517_v41, %v1434_v44 }
 0x22b   :  { %v1440_v47 = vpop.f32.mrf.mxu1  ;;  %v1525_v51 = vpop.f32.mrf.mxu0 }
 0x22c   :  { %v1441_v62 = vadd.f32 %v1440_v47, %v1352_v52  ;;  %v1524_v3 = vadd.f32 %v1523_v12, %v1439_v56 }
 0x22d   :  { %v1599_v48 = vpop.f32.mrf.mxu1  ;;  %v1686_v50 = vpop.f32.mrf.mxu0 }
 0x22e   :  { %v1600_v63 = vadd.f32 %v1599_v48, %v1516_v53  ;;  %v1526_v7 = vadd.f32 %v1525_v51, %v1441_v62 }
 0x22f   :  { %v1601_v58 = vpop.f32.mrf.mxu1  ;;  %v1688_v59 = vpop.f32.mrf.mxu0 }
 0x230   :  { %v1602_v5 = vadd.f32 %v1601_v58, %v1518_v60  ;;  %v1687_v8 = vadd.f32 %v1686_v50, %v1600_v63 }
 0x231   :  { %v1608_v2 = vpop.f32.mrf.mxu1  ;;  %v1693_v1 = vpop.f32.mrf.mxu0 }
 0x232   :  { %v1609_v16 = vadd.f32 %v1608_v2, %v1524_v3  ;;  %v1689_v20 = vadd.f32 %v1688_v59, %v1602_v5 }
 0x233   :  { %v1610_v6 = vpop.f32.mrf.mxu1  ;;  %v1695_v24 = vpop.f32.mrf.mxu0 }
 0x234   :  { %v1611_v21 = vadd.f32 %v1610_v6, %v1526_v7  ;;  %v1694_v25 = vadd.f32 %v1693_v1, %v1609_v16 }
 0x235   :  { %v1767_v19 = vpop.f32.mrf.mxu1 }
 0x236   :  { %v1768_v23 = vadd.f32 %v1767_v19, %v1687_v8  ;;  %v1696_v32 = vadd.f32 %v1695_v24, %v1611_v21 }
 0x237   :  { %v1769_v14 = vpop.f32.mrf.mxu1 }
 0x238   :  { %v1779_v28 = vadd.f32 1e-05, %v1768_v23  ;;  %v1770_v29 = vadd.f32 %v1769_v14, %v1689_v20 }
 0x239   :  { %v1774_v30 = vpop.f32.mrf.mxu1 }
 0x23a   :  { %1871 = vrcp.f32 %v1779_v28  ;;  %v1780_v33 = vadd.f32 1e-05, %v1770_v29  ;;  %v1775_v34 = vadd.f32 %v1774_v30, %v1694_v25 }
 0x23b   :  { %v1776_v35 = vpop.f32.mrf.mxu1 }
 0x23c   :  { %1873 = vrcp.f32 %v1780_v33  ;;  %v1781_v37 = vadd.f32 1e-05, %v1775_v34  ;;  %v1777_v15 = vadd.f32 %v1776_v35, %v1696_v32 }
 0x23e   :  { %1875 = vrcp.f32 %v1781_v37  ;;  %v1782_v42 = vadd.f32 1e-05, %v1777_v15 }
 0x240   :  { %1877 = vrcp.f32 %v1782_v42 }
 0x247   :  { %v1872_v49 = vpop.eup %1871 }
 0x248   :  { %v1787_v55 = vmul.f32 %v1872_v49, %v1779_v28 }
 0x249   :  { %v1874_v61 = vpop.eup %1873 }
 0x24a   :  { %v1791_v9 = vsub.f32 2.0, %v1787_v55  ;;  %v1788_v4 = vmul.f32 %v1874_v61, %v1780_v33 }
 0x24b   :  { %v1876_v10 = vpop.eup %1875 }
 0x24c   :  { %v1795_v13 = vmul.f32 %v1872_v49, %v1791_v9  ;;  %v1792_v17 = vsub.f32 2.0, %v1788_v4  ;;  %v1789_v22 = vmul.f32 %v1876_v10, %v1781_v37 }
 0x24d   :  { %v1878_v11 = vpop.eup %1877 }
 0x24e   :  { %v1799_v26 = vmul.f32 %v1795_v13, %v1779_v28  ;;  %v1796_v31 = vmul.f32 %v1874_v61, %v1792_v17  ;;  %v1793_v27 = vsub.f32 2.0, %v1789_v22  ;;  %v1790_v36 = vmul.f32 %v1878_v11, %v1782_v42 }
 0x250   :  { %v1803_v38 = vsub.f32 2.0, %v1799_v26  ;;  %v1800_v41 = vmul.f32 %v1796_v31, %v1780_v33  ;;  %v1797_v46 = vmul.f32 %v1876_v10, %v1793_v27  ;;  %v1794_v54 = vsub.f32 2.0, %v1790_v36 }
 0x252   :  { %v1807_v12 = vmul.f32 %v1803_v38, %v1795_v13  ;;  %v1804_v57 = vsub.f32 2.0, %v1800_v41  ;;  %v1801_v40 = vmul.f32 %v1797_v46, %v1781_v37  ;;  %v1798_v47 = vmul.f32 %v1878_v11, %v1794_v54 }
 0x254   :  { %v1811_v51 = vmul.f32 %v2299_v0, %v1807_v12  ;;  %v1808_v39 = vmul.f32 %v1804_v57, %v1796_v31  ;;  %v1805_v44 = vsub.f32 2.0, %v1801_v40  ;;  %v1802_v48 = vmul.f32 %v1798_v47, %v1782_v42 }
 0x256   :  { %v1812_v50 = vmul.f32 %v2302_v18, %v1808_v39  ;;  %v1809_v52 = vmul.f32 %v1805_v44, %v1797_v46  ;;  %v1806_v53 = vsub.f32 2.0, %v1802_v48  ;;  %v1840_v56 = vadd.f32 -0.5, %v1811_v51 }
 0x258   :  { %v1813_v58 = vmul.f32 %v2305_v43, %v1809_v52  ;;  %v1810_v59 = vmul.f32 %v1806_v53, %v1798_v47  ;;  %v1841_v60 = vadd.f32 -0.5, %v1812_v50  ;;  %1819 = vst [vmem:[#allocation5] sm:$0xff] %v1840_v56 }
 0x25a   :  { %v1814_v62 = vmul.f32 %v2308_v45, %v1810_v59  ;;  %v1842_v63 = vadd.f32 -0.5, %v1813_v58  ;;  %1820 = vst [vmem:[#allocation5 + $0x8] sm:$0xff] %v1841_v60 }
 0x25c   :  { %v1843_v0 = vadd.f32 -0.5, %v1814_v62  ;;  %1821 = vst [vmem:[#allocation5 + $0x10] sm:$0xf] %v1842_v63 }
 0x25e   :  { %1822 = vst [vmem:[#allocation5 + $0x18] sm:$0xf] %v1843_v0 }
 0x25f   :  { %1910 = shalt.err (!%p1907_p9)
}
 0x260   :  { %1834 = dma.vmem_to_hbm [thread:$0]  %s1829_s15, 512, %s2327_s6, [#allocation4], %s1924_s24, %s1924_s24, %s1925_s25  }
 0x261   :  { %1921 = dma.done.wait [#allocation4], 512  }
 0x262   :  { %1922 = vsyncadd [#allocation4], 4294966784 }
 0x263   :  { %1838 = vsyncpa [#allocation3], 1 }
 0x264   :  { %1839 = vsyncpa [#allocation4], 1 }

</bundles_post_ra>
